<compile_context>
chip_gen: v6e
topology: v6e:2x2x1
jax: 0.10.0
libtpu: 0.0.40
codegen_flags: <defaults>
</compile_context>

<pallas_src>
import jax
import jax.numpy as jnp
from jax.experimental import pallas as pl
from jax.experimental.pallas import tpu as pltpu


# ----------------------------- kernels --------------------------------------

def _conv_bn_relu_kernel_cmajor(x_ref, w_ref, b_ref, o_ref):
    # x_ref: (1, Cin, tn) f32   w_ref: (Cout, Cin) bf16   b_ref: (Cout, 1) f32
    # o_ref: (1, Cout, tn)      NCHW layout, HW (lane dim) >= 128.
    x = x_ref[0].astype(jnp.bfloat16)          # in-kernel cast: VPU filler,
    acc = jnp.dot(w_ref[...], x,               # x read from HBM exactly once
                  preferred_element_type=jnp.float32)
    o_ref[0] = jnp.maximum(acc + b_ref[...], 0.0).astype(o_ref.dtype)


def _conv_bn_relu_kernel_cminor(x_ref, wt_ref, b_ref, o_ref):
    # Small-feature-map orientation (HW < 128, Cout >= 128): put Cout on the
    # lane dim so stores stay unmasked.
    # x_ref: (1, Cin, HW) f32   wt_ref: (Cin, Cout) bf16   b_ref: (1, Cout) f32
    # o_ref: (1, HW, Cout)
    x = x_ref[0].astype(jnp.bfloat16)                       # (Cin, HW)
    acc = jax.lax.dot_general(                              # (HW, Cout)
        x, wt_ref[...],
        dimension_numbers=(((0,), (0,)), ((), ())),
        preferred_element_type=jnp.float32)
    o_ref[0] = jnp.maximum(acc + b_ref[...], 0.0).astype(o_ref.dtype)


# ----------------------------- helpers ---------------------------------------

def _vmem_limit_bytes():
    """Per-generation scoped-VMEM limit: v7x has 64 MiB physical per TC,
    v5e/v6e have 128 MiB; fall back conservatively elsewhere."""
    try:
        kind = jax.devices()[0].device_kind.lower()
    except Exception:
        kind = ""
    if "v7" in kind:
        return 48 * 1024 * 1024
    if "v5" in kind or "v6" in kind:
        return 100 * 1024 * 1024
    return 32 * 1024 * 1024


def _pick_hw_tile(hw, cin, cout, x_bytes, out_bytes, vmem_budget, n_batch,
                  max_tile=8192):
    """HW (lane) tile: a multiple of 128 (Pallas masks the ragged last block),
    sized so double-buffered x/out tiles + weights fit the VMEM budget, and
    capped so the grid has >= 2 total steps (keeps both v7x TCs busy)."""
    if hw <= 128:
        return hw                                  # single full-extent block
    per_lane = 2 * (cin * x_bytes + cout * out_bytes)      # double-buffered
    fixed = 4 * cout * cin * 2 + 4 * cout * 4              # weight/bias bufs
    cap = (vmem_budget - fixed) // max(per_lane, 1)
    cap = max(128, min(max_tile, (cap // 128) * 128))
    hw_padded = ((hw + 127) // 128) * 128
    tn = min(cap, hw_padded)
    # Guarantee >= 2 grid steps for v7x megacore sharding when possible.
    if n_batch * ((hw + tn - 1) // tn) < 2:
        tn = max(128, ((hw // 2 + 127) // 128) * 128)
    return tn


# ----------------------------- wrapper ---------------------------------------

def basic_conv2d_1x1(x_nchw, conv_w, conv_b, gamma, beta,
                     running_mean, running_var, eps=1e-5,
                     out_dtype=jnp.bfloat16):
    """Fused 1x1 conv + eval-mode BatchNorm2d + ReLU.

    x_nchw : (N, Cin, H, W) float32
    conv_w : (Cout, Cin, 1, 1); conv_b, gamma, beta, mean, var : (Cout,)
    returns: (N, Cout, H, W) in out_dtype (default bf16 for inference).
    """
    N, Cin, H, W = x_nchw.shape
    Cout, wc_in, kh, kw = conv_w.shape
    assert (wc_in, kh, kw) == (Cin, 1, 1), "only 1x1 stride-1 conv supported"
    HW = H * W
    f32 = jnp.float32

    # Fold BN into per-output-channel scale / bias (all in f32).
    inv_std = 1.0 / jnp.sqrt(running_var.astype(f32) + eps)
    scale = gamma.astype(f32) * inv_std                               # (Cout,)
    bias = (conv_b.astype(f32) - running_mean.astype(f32)) * scale \
        + beta.astype(f32)                                            # (Cout,)

    # Fold BN scale into the conv weight (f32 fold, then bf16 for the MXU).
    w_scaled = (conv_w.reshape(Cout, Cin).astype(f32)
                * scale[:, None]).astype(jnp.bfloat16)

    # NCHW -> (N, Cin, HW): pure reshape (HW is already minor). Keep f32; the
    # bf16 cast happens inside the kernel.
    x3 = x_nchw.reshape(N, Cin, HW)

    x_bytes = x3.dtype.itemsize
    out_bytes = jnp.dtype(out_dtype).itemsize
    vmem_limit = _vmem_limit_bytes()

    cost = pl.CostEstimate(
        flops=2 * N * Cout * Cin * HW,
        transcendentals=0,
        bytes_accessed=(N * Cin * HW * x_bytes + Cout * Cin * 2 + Cout * 4
                        + N * Cout * HW * out_bytes))

    if HW < 128 and Cout >= 128:
        # Channels-last orientation: Cout is the lane dim -> unmasked stores.
        wt = w_scaled.T                                    # (Cin, Cout) bf16
        bias_row = bias.reshape(1, Cout)
        out = pl.pallas_call(
            _conv_bn_relu_kernel_cminor,
            out_shape=jax.ShapeDtypeStruct((N, HW, Cout), out_dtype),
            grid_spec=pltpu.PrefetchScalarGridSpec(
                num_scalar_prefetch=0,
                grid=(N,),
                in_specs=[
                    pl.BlockSpec((1, Cin, HW), lambda n: (n, 0, 0)),
                    pl.BlockSpec((Cin, Cout), lambda n: (0, 0)),
                    pl.BlockSpec((1, Cout), lambda n: (0, 0)),
                ],
                out_specs=pl.BlockSpec((1, HW, Cout), lambda n: (n, 0, 0)),
            ),
            compiler_params=pltpu.CompilerParams(
                dimension_semantics=("parallel",),
                vmem_limit_bytes=vmem_limit),
            cost_estimate=cost,
        )(x3, wt, bias_row)
        # Back to NCHW (one wrapper transpose; consumers accepting
        # channels-last layouts can skip this).
        return out.reshape(N, H, W, Cout).transpose(0, 3, 1, 2)

    # Standard path: HW (>= 128) stays the lane dim, output written in NCHW.
    bias_col = bias.reshape(Cout, 1)
    tn = _pick_hw_tile(HW, Cin, Cout, x_bytes, out_bytes,
                       int(vmem_limit * 0.7), N)
    num_hw_blocks = (HW + tn - 1) // tn

    out = pl.pallas_call(
        _conv_bn_relu_kernel_cmajor,
        out_shape=jax.ShapeDtypeStruct((N, Cout, HW), out_dtype),
        grid_spec=pltpu.PrefetchScalarGridSpec(
            num_scalar_prefetch=0,
            grid=(N, num_hw_blocks),
            in_specs=[
                pl.BlockSpec((1, Cin, tn), lambda n, j: (n, 0, j)),   # x tile
                pl.BlockSpec((Cout, Cin), lambda n, j: (0, 0)),       # weight
                pl.BlockSpec((Cout, 1), lambda n, j: (0, 0)),         # bias
            ],
            out_specs=pl.BlockSpec((1, Cout, tn), lambda n, j: (n, 0, j)),
        ),
        compiler_params=pltpu.CompilerParams(
            dimension_semantics=("parallel", "parallel"),
            vmem_limit_bytes=vmem_limit),
        cost_estimate=cost,
    )(x3, w_scaled, bias_col)

    return out.reshape(N, Cout, H, W)


# ----------------------------- reference -------------------------------------

def _reference(x_nchw, conv_w, conv_b, gamma, beta, mean, var, eps=1e-5):
    # Plain-JAX f32 reference: 1x1 conv == channel einsum, eval-BN, ReLU.
    y = jnp.einsum("nchw,oc->nohw", x_nchw,
                   conv_w.reshape(conv_w.shape[0], -1))
    y = y + conv_b[None, :, None, None]
    y = (y - mean[None, :, None, None]) / jnp.sqrt(var[None, :, None, None] + eps)
    y = y * gamma[None, :, None, None] + beta[None, :, None, None]
    return jnp.maximum(y, 0.0)


if __name__ == "__main__":
    # --- Test 1: standard NCHW-lane path (HW >= 128, small Cout) ---
    key = jax.random.PRNGKey(0)
    k_x, k_w, k_b, k_g, k_be, k_m, k_v = jax.random.split(key, 7)

    N, Cin, H, W, Cout = 2, 4, 16, 16, 8
    x = jax.random.normal(k_x, (N, Cin, H, W), dtype=jnp.float32)
    conv_w = jax.random.normal(k_w, (Cout, Cin, 1, 1), dtype=jnp.float32) * 0.1
    conv_b = jax.random.normal(k_b, (Cout,), dtype=jnp.float32) * 0.1
    gamma = 1.0 + 0.1 * jax.random.normal(k_g, (Cout,), dtype=jnp.float32)
    beta = 0.1 * jax.random.normal(k_be, (Cout,), dtype=jnp.float32)
    mean = 0.1 * jax.random.normal(k_m, (Cout,), dtype=jnp.float32)
    var = jnp.abs(1.0 + 0.1 * jax.random.normal(k_v, (Cout,), dtype=jnp.float32))

    out = jax.block_until_ready(
        basic_conv2d_1x1(x, conv_w, conv_b, gamma, beta, mean, var))
    ref = _reference(x, conv_w, conv_b, gamma, beta, mean, var)
    assert out.shape == (N, Cout, H, W)
    # bf16 MXU inputs + bf16 output -> loosened tolerance.
    assert jnp.allclose(out.astype(jnp.float32), ref, atol=3e-2, rtol=3e-2)

    # --- Test 2: channels-last orientation (HW < 128, Cout >= 128) ---
    keys2 = jax.random.split(jax.random.PRNGKey(1), 7)
    N2, Cin2, H2, W2, Cout2 = 2, 16, 8, 8, 128
    x2 = jax.random.normal(keys2[0], (N2, Cin2, H2, W2), dtype=jnp.float32)
    w2 = jax.random.normal(keys2[1], (Cout2, Cin2, 1, 1), dtype=jnp.float32) * 0.1
    b2 = jax.random.normal(keys2[2], (Cout2,), dtype=jnp.float32) * 0.1
    g2 = 1.0 + 0.1 * jax.random.normal(keys2[3], (Cout2,), dtype=jnp.float32)
    be2 = 0.1 * jax.random.normal(keys2[4], (Cout2,), dtype=jnp.float32)
    m2 = 0.1 * jax.random.normal(keys2[5], (Cout2,), dtype=jnp.float32)
    v2 = jnp.abs(1.0 + 0.1 * jax.random.normal(keys2[6], (Cout2,), dtype=jnp.float32))

    out2 = jax.block_until_ready(
        basic_conv2d_1x1(x2, w2, b2, g2, be2, m2, v2))
    ref2 = _reference(x2, w2, b2, g2, be2, m2, v2)
    assert out2.shape == (N2, Cout2, H2, W2)
    assert jnp.allclose(out2.astype(jnp.float32), ref2, atol=3e-2, rtol=3e-2)

    print("KERNEL_OK")
</pallas_src>

<mosaic_0001>
module attributes {stable_mosaic.version = 11 : i64} {
  func.func @_conv_bn_relu_kernel_cmajor(%arg0: i32, %arg1: i32, %arg2: memref<1x4x256xf32, #tpu.memory_space<vmem>>, %arg3: memref<8x4xbf16, #tpu.memory_space<vmem>>, %arg4: memref<8x1xf32, #tpu.memory_space<vmem>>, %arg5: memref<1x8x256xbf16, #tpu.memory_space<vmem>>) attributes {dimension_semantics = [#tpu.dimension_semantics<parallel>, #tpu.dimension_semantics<parallel>], iteration_bounds = array<i64: 2, 1>, scalar_prefetch = 0 : i64, scratch_operands = 0 : i64, tpu.core_type = #tpu.core_type<tc>, window_params = [{transform_indices = @transform_0, window_bounds = array<i64: 1, 4, 256>}, {pipeline_mode = #tpu.pipeline_mode<synchronous>, transform_indices = @transform_1, window_bounds = array<i64: 8, 4>}, {pipeline_mode = #tpu.pipeline_mode<synchronous>, transform_indices = @transform_2, window_bounds = array<i64: 8, 1>}, {transform_indices = @transform_3, window_bounds = array<i64: 1, 8, 256>}]} {
    %c0 = arith.constant 0 : index
    %c0_0 = arith.constant 0 : index
    %c0_1 = arith.constant 0 : index
    %0 = vector.load %arg2[%c0, %c0_0, %c0_1] : memref<1x4x256xf32, #tpu.memory_space<vmem>>, vector<1x4x256xf32>
    %1 = vector.shape_cast %0 : vector<1x4x256xf32> to vector<4x256xf32>
    %2 = arith.truncf %1 : vector<4x256xf32> to vector<4x256xbf16>
    %c0_2 = arith.constant 0 : index
    %c0_3 = arith.constant 0 : index
    %3 = vector.load %arg3[%c0_2, %c0_3] : memref<8x4xbf16, #tpu.memory_space<vmem>>, vector<8x4xbf16>
    %cst = arith.constant dense<0.000000e+00> : vector<8x256xf32>
    %4 = tpu.matmul %3, %2, %cst {dimension_numbers = #tpu.dot_dimension_numbers<[1], [0], [0], [1], [0, 0, 1, 1], [], []>} : vector<8x4xbf16>, vector<4x256xbf16>, vector<8x256xf32> -> vector<8x256xf32>
    %c0_4 = arith.constant 0 : index
    %c0_5 = arith.constant 0 : index
    %5 = vector.load %arg4[%c0_4, %c0_5] : memref<8x1xf32, #tpu.memory_space<vmem>>, vector<8x1xf32>
    %6 = vector.broadcast %5 : vector<8x1xf32> to vector<8x256xf32>
    %7 = arith.addf %4, %6 : vector<8x256xf32>
    %cst_6 = arith.constant 0.000000e+00 : f32
    %8 = vector.broadcast %cst_6 : f32 to vector<8x256xf32>
    %9 = arith.maximumf %7, %8 : vector<8x256xf32>
    %10 = arith.truncf %9 : vector<8x256xf32> to vector<8x256xbf16>
    %c0_7 = arith.constant 0 : index
    %c0_8 = arith.constant 0 : index
    %c0_9 = arith.constant 0 : index
    %11 = vector.load %arg5[%c0_7, %c0_8, %c0_9] : memref<1x8x256xbf16, #tpu.memory_space<vmem>>, vector<1x8x256xbf16>
    %12 = vector.shape_cast %11 : vector<1x8x256xbf16> to vector<8x256xbf16>
    %13 = vector.shape_cast %10 : vector<8x256xbf16> to vector<1x8x256xbf16>
    tpu.vector_store %arg5[%c0_7, %c0_8, %c0_9], %13 {strides = array<i32>} : memref<1x8x256xbf16, #tpu.memory_space<vmem>>, vector<1x8x256xbf16>,
    return
  }
  func.func @transform_0(%arg0: i32, %arg1: i32) -> (i32, i32, i32) {
    %c0_i32 = arith.constant 0 : i32
    %c0_i32_0 = arith.constant 0 : i32
    return %arg0, %c0_i32, %arg1 : i32, i32, i32
  }
  func.func @transform_1(%arg0: i32, %arg1: i32) -> (i32, i32) {
    %c0_i32 = arith.constant 0 : i32
    %c0_i32_0 = arith.constant 0 : i32
    %c0_i32_1 = arith.constant 0 : i32
    return %c0_i32, %c0_i32_0 : i32, i32
  }
  func.func @transform_2(%arg0: i32, %arg1: i32) -> (i32, i32) {
    %c0_i32 = arith.constant 0 : i32
    %c0_i32_0 = arith.constant 0 : i32
    %c0_i32_1 = arith.constant 0 : i32
    return %c0_i32, %c0_i32_0 : i32, i32
  }
  func.func @transform_3(%arg0: i32, %arg1: i32) -> (i32, i32, i32) {
    %c0_i32 = arith.constant 0 : i32
    %c0_i32_0 = arith.constant 0 : i32
    return %arg0, %c0_i32, %arg1 : i32, i32, i32
  }
}

</mosaic_0001>

<bundles_post_ra>
// kernel: tpu_custom_call.1
= control target key start
LH: loop header
LB: loop body
LE: loop exit
PB: predicated region body
PF: predicated region fallthrough
CT: control target
= control target key end

     0   :  { %8 = vsyncpa [#allocation3], 0  ;;  %s744_s0 = inlined_call_operand.hbm [shape: f32[2,4,256], index: 0, kind: input, shape index: {}]   ;;  %s745_s1 = inlined_call_operand.vmem [shape: bf16[8,4], index: 1, kind: input, shape index: {}]   ;;  %s746_s2 = inlined_call_operand.vmem [shape: f32[8,1], index: 2, kind: input, shape index: {}]   ;;  %s747_s3 = inlined_call_operand.hbm [shape: bf16[2,8,256], index: 3, kind: output, shape index: {}]  }
   0x1   :  { %10 = vsyncpa [#allocation3 + $0x1], 0 }
   0x2   :  { %11 = vsyncpa [#allocation4], 0 }
   0x3   :  { %13 = vsyncpa [#allocation4 + $0x1], 0  ;;  %s604_s12 = smov 0   ;;  %s606_s13 = smov 0  }
   0x4   :  { %s608_s14 = smov 0   ;;  %s610_s15 = smov 0  }
   0x5   :  { %s612_s16 = smov 0   ;;  %s614_s17 = smov 0  }
   0x6 LB: > { %s385_s18 = sadd.s32 4294967295, %s579_s17   ;;  %s386_s19 = sadd.s32 4294967294, %s579_s17   ;;  %s579_s17 = sphi %s614_s17, %s19_s17   ;;  %s575_s16 = sphi %s612_s16, %s759_s16   ;;  %s571_s15 = sphi %s610_s15, %s758_s15   ;;  %s567_s14 = sphi %s608_s14, %s757_s14   ;;  %s563_s13 = sphi %s606_s13, %s756_s13   ;;  %s559_s12 = sphi %s604_s12, %s755_s12  }
   0x7   : > { %s31_s20 = sadd.s32 1, %s575_s16  ;;  %s40_s21 = sadd.s32 1, %s567_s14 }
   0x8   : > { %p33_p0 = scmp.ge.s32.totalorder %s31_s20, 2  ;;  %p47_p1 = scmp.ne.s32.totalorder %s567_s14, %s563_s13 }
   0x9   : > { %p48_p2 = scmp.eq.s32.totalorder %s579_s17, 0  ;;  %p53_p3 = scmp.ne.s32.totalorder %s563_s13, %s559_s12 }
   0xa   : > { %s761_s20 = smov (%p33_p0, %s31_s20), 0  ;;  %p54_p5 = scmp.eq.s32.totalorder %s385_s18, 0 }
   0xb   : > { %p645_p4 = por %p48_p2, %p47_p1  ;;  %s35_s23 = ssub.s32 %s575_s16, %s761_s20 }
   0xc   : > { %p121_p6 = scmp.eq.s32.totalorder %s385_s18, 1  ;;  %p38_p7 = scmp.eq.s32.totalorder %s35_s23, 0 }
   0xd   : > { %p651_p8 = por %p54_p5, %p53_p3  ;;  %p127_p10 = scmp.eq.s32.totalorder %s386_s19, 1 }
   0xe   : > { %p655_p9 = por %p121_p6, %p47_p1  ;;  %p418_p13 = scmp.lt.s32.totalorder %s579_s17, 2 }
   0xf   : > { %s660_s26 = scalar_select %p38_p7, %s567_s14, %s40_s21  }
  0x10   : > { %p662_p11 = por %p127_p10, %p53_p3  ;;  %s153_s28 = sand.u32 1, %s567_s14  }
  0x11   : > { %s389_s29 = sshll.u32 %s153_s28, 3  ;;  %s403_s30 = sshll.u32 %s575_s16, 7 }
  0x12   : > { %s751_s27 = scalar_select %p662_p11, 1, 0 }
  0x13   : > { %s165_s6 = scalar_lea.hbm %s744_s0, %s403_s30  ;;  %s157_s7 = scalar_lea.vmem [#allocation2], %s389_s29 }
  0x14   : > { %s167_s8 = sshll.u32 %s157_s7, 4  ;;  %p675_p0 = pnand %p418_p13, %p645_p4  ;;  %s168_s8 = int_to_ptr.vmem [resolvable:$true] %s167_s8 }
  0x15   : > { %p392_p1 = scmp.ge.s32.totalorder %s579_s17, 1  ;;  %p172_p2 = scmp.lt.s32.totalorder %s579_s17, 3 }
  0x16   : > { %s154_s10 = scalar_lea.sflag [#allocation3], %s153_s28  ;;  %p473_p3 = pneg %p675_p0 }
  0x17   : > { %s484_s11 = scalar_lea.vmem %s168_s8, 128  ;;  %s581_s18 = smov [#allocation2]  }
  0x18   : > { %p485_p5 = scmp.ne.s32.totalorder %s168_s8, %s484_s11  ;;  %s489_s19 = sshll.u32 %s581_s18, 4  ;;  %s490_s19 = int_to_ptr.vmem [resolvable:$false] %s489_s19 }
  0x19   : > { %s491_s21 = scalar_lea.vmem %s490_s19, 256  ;;  %p492_p10 = scmp.lt.s32.totalorder %s168_s8, %s490_s19 }
  0x1a   : > { %p487_p6 = pnand %p485_p5, %p473_p3  ;;  %p493_p12 = scmp.lt.s32.totalorder %s491_s21, %s484_s11 }
  0x1c   : > { %p488_p7 = pneg %p487_p6  ;;  %p494_p4 = por %p493_p12, %p492_p10 }
  0x1e   : > { %p495_p13 = pnand %p494_p4, %p488_p7 }
  0x20   : > { %498 = shalt.err (!%p495_p13)
}
  0x21   : > { %413 = dma.hbm_to_vmem [thread:$0]  (!%p675_p0), %s165_s6, 128, %s168_s8, %s154_s10  }
  0x22   : > { %p173_p11 = pnand %p392_p1, %p172_p2 }
  0x23   : > { %s690_s22 = sand.u32 (!%p173_p11), 1, %s563_s13  }
  0x24   : > { %176 = sbr.rel (%p173_p11) target bundleno = 265 (0x109), region = 32  ;;  %s393_s23 = sshll.u32 (!%p173_p11), %s690_s22, 3 }
  0x25   : > { %s179_s28 = scalar_lea.sflag (!%p173_p11), [#allocation3], %s690_s22  ;;  %s182_s29 = scalar_lea.vmem (!%p173_p11), [#allocation2], %s393_s23 }
  0x29   : > { %550 = dma.done.wait (%p651_p8), %s179_s28, 128  }
  0x2a   : > { %552 = vsyncadd (%p651_p8), %s179_s28, 4294967168  ;;  %v582_v0 = vmov 0   ;;  %v208_v1 = vld [vmem:[%s182_s29] sm:$0xff]  ;;  %vm225_vm0 = vcmask 1041408   ;;  %vm221_vm1 = vcmask 31744   ;;  %s405_s6 = sshll.u32 %s571_s15, 7 }
  0x2b   : > { %264 = vmatprep.mubr.bf16.mxu0 %v582_v0  ;;  %469 = vset.pattern.permute.xlu0 %v582_v0  ;;  %v215_v2 = vld [vmem:[%s746_s2] sm:$0xff]  ;;  %v210_v3 = vcombine.high %v208_v1, %v208_v1  ;;  %v212_v4 = vpack.c.bf16 %v208_v1, %v208_v1  ;;  %s204_s7 = scalar_lea.vmem [#allocation5], %s393_s23  ;;  %s299_s11 = scalar_lea.hbm %s747_s3, %s405_s6 }
  0x2c   : > { %218 = vperm.xlu0 %469, %v215_v2   ;;  %v214_v7 = vld [vmem:[%s745_s1] sm:$0xf]  ;;  %s301_s8 = sshll.u32 %s204_s7, 4  ;;  %s285_s18 = scalar_lea.sflag [#allocation4], %s690_s22  ;;  %s302_s8 = int_to_ptr.vmem [resolvable:$true] %s301_s8 }
  0x2d   : > { %v213_v5 = vpack.c.bf16 %v210_v3, %v210_v3  ;;  %v227_v6 = vsel %vm225_vm0, %v212_v4, 0  ;;  %s499_s19 = scalar_lea.vmem %s302_s8, 128  ;;  %s583_s21 = smov [#allocation5]  }
  0x2e   : > { %p500_p8 = scmp.ne.s32.totalorder %s302_s8, %s499_s19  ;;  %s503_s15 = sshll.u32 %s583_s21, 4  ;;  %s504_s15 = int_to_ptr.vmem [resolvable:$false] %s503_s15 }
  0x2f   : > { %395 = vmatprep.subr.msk.bf16.mxu0 %vm225_vm0, %v213_v5  ;;  %s505_s23 = scalar_lea.vmem %s504_s15, 256  ;;  %p506_p0 = scmp.lt.s32.totalorder %s302_s8, %s504_s15 }
  0x30   : > { %247 = vmatpush1.bf16.msra.mxu0 %v227_v6  ;;  %p501_p11 = pnand %p500_p8, %p655_p9  ;;  %p507_p1 = scmp.lt.s32.totalorder %s505_s23, %s499_s19 }
  0x32   : > { %p502_p12 = pneg %p501_p11  ;;  %p508_p2 = por %p507_p1, %p506_p0 }
  0x33   : > { %396 = vmatmul.mubr.msk.bf16.vlgmr.msra.gmra.mxu0 %vm221_vm1, %v214_v7 }
  0x34   : > { %p509_p3 = pnand %p508_p2, %p502_p12 }
  0xa7   : > { %v219_v8 = vpop.permute.xlu0 %218 }
  0xf3   : > { %v266_v9 = vpop.f32.mrf.mxu0 }
  0xf4   : > { %v267_v10 = vadd.f32 %v266_v9, %v219_v8 }
  0xf5   : > { %v268_v11 = vpop.f32.mrf.mxu0 }
  0xf6   : > { %v269_v12 = vadd.f32 %v268_v11, %v219_v8  ;;  %v273_v14 = vmax.f32 %v267_v10, 0.0 }
  0xf7   : > { %v270_v13 = vpop.f32.mrf.mxu0 }
  0xf8   : > { %v274_v15 = vmax.f32 %v269_v12, 0.0 }
  0xf9   : > { %v271_v16 = vpop.f32.mrf.mxu0 }
  0xfa   : > { %v404_v17 = vpack.c.bf16 %v274_v15, %v273_v14 }
  0xfc   : > { %283 = vst [vmem:[%s204_s7] sm:$0xff] %v404_v17 }
  0xfd   : > { %512 = shalt.err (!%p509_p3)
}
  0xfe   : > { %s513_s28 = scalar_lea.hbm %s299_s11, 128  ;;  %s517_s30 = scalar_lea.hbm %s747_s3, 256 }
  0xff   : > { %p514_p5 = scmp.ne.s32.totalorder %s299_s11, %s513_s28  ;;  %p518_p10 = scmp.lt.s32.totalorder %s299_s11, %s747_s3 }
 0x100   : > { %p519_p4 = scmp.lt.s32.totalorder %s517_s30, %s513_s28 }
 0x101   : > { %p515_p6 = pnand %p514_p5, %p655_p9 }
 0x102   : > { %p520_p13 = por %p519_p4, %p518_p10 }
 0x103   : > { %p516_p7 = pneg %p515_p6 }
 0x105   : > { %p521_p8 = pnand %p520_p13, %p516_p7 }
 0x107   : > { %524 = shalt.err (!%p521_p8)
}
 0x108   : > { %408 = dma.vmem_to_hbm [thread:$0]  (%p655_p9), %s302_s8, 128, %s299_s11, %s285_s18  }
 0x109 PF: > { %s313_s24 = sand.u32 1, %s559_s12   ;;  %p753_p11 = scmp.ne.s32.totalorder %s751_s27, 0 }
 0x10a   : > { %p754_p12 = scmp.ge.s32.totalorder %s579_s17, 2  ;;  %s314_s6 = scalar_lea.sflag [#allocation4], %s313_s24 }
 0x10c   : > { %p415_p0 = pnand %p754_p12, %p753_p11 }
 0x10e   : > { %p416_p1 = pneg %p415_p0 }
 0x110   : > { %554 = dma.done.wait (%p416_p1), %s314_s6, 128  }
 0x111   : > { %556 = vsyncadd (%p416_p1), %s314_s6, 4294967168  ;;  %s19_s17 = sadd.s32 1, %s579_s17   ;;  %s755_s12 = smov %s563_s13 }
 0x112   : > { %p16_p2 = scmp.ge.s32.totalorder %s19_s17, 4   ;;  %s756_s13 = smov %s567_s14 }
 0x113   : > { %s757_s14 = smov %s660_s26  ;;  %s758_s15 = smov %s575_s16 }
 0x114   : > { %s759_s16 = smov %s761_s20  ;;  %18 = sbr.rel (!%p16_p2) target bundleno = 6 (0x6), region = 77 }
 0x119   :  { %319 = vsyncpa [#allocation3], 1 }
 0x11a   :  { %321 = vsyncpa [#allocation3 + $0x1], 1 }
 0x11b   :  { %322 = vsyncpa [#allocation4], 1 }
 0x11c   :  { %324 = vsyncpa [#allocation4 + $0x1], 1 }

</bundles_post_ra>
